<compile_context>
chip_gen: v7x
topology: tpu7x:2x2x1
jax: 0.10.0
libtpu: 0.0.40
codegen_flags: <defaults>
</compile_context>

<pallas_src>
import jax
import jax.numpy as jnp
from jax import lax
from jax.experimental import pallas as pl
from jax.experimental.pallas import tpu as pltpu

TEXT_RATIO = 0.7
EPS = 1e-6
DEFAULT_TILE = 32768          # lanes per HW tile (multiple of 128)


def _dice_sums_kernel(hw_ref, pred_ref, gtk_ref, aux_ref, out_ref, acc_ref):
    # Block shapes:
    #   pred_ref: (1, C, T)    raw logits (kernels 0..C-2, text channel C-1)
    #   gtk_ref : (1, C-1, T)  int8 binary gt kernel maps
    #   aux_ref : (1, 3, T)    int8 [gt_text, ohem_mask, training_mask]
    #   out_ref : (1, C, 3)    f32 [a, b, c] per channel (written at last tile)
    #   acc_ref : (C, 3)       f32 running accumulator (VMEM scratch)
    t = pl.program_id(1)

    @pl.when(t == 0)
    def _():
        acc_ref[...] = jnp.zeros_like(acc_ref)

    pred_raw = pred_ref[0].astype(jnp.float32)            # (C, T)
    C, T = pred_raw.shape

    # Ragged last tile: lanes >= HW hold garbage from the partial edge DMA.
    # Zero the logits there (kills NaN/Inf) and fold validity into the masks.
    lane = lax.broadcasted_iota(jnp.int32, (1, T), 1) + t * T
    valid_b = lane < hw_ref[0]                            # (1, T) bool
    valid = valid_b.astype(jnp.float32)                   # (1, T) {0,1}
    pred = jnp.where(valid_b, pred_raw, 0.0)              # (C, T)

    # Single-EUP sigmoid: sigmoid(x) == 0.5 * (tanh(0.5 * x) + 1).
    p = 0.5 * (jnp.tanh(0.5 * pred) + 1.0)                # (C, T)

    gk = gtk_ref[0].astype(jnp.float32)                   # (C-1, T) binary
    aux = aux_ref[0].astype(jnp.float32)                  # (3, T)
    g_text = aux[0:1]                                     # (1, T) binary
    mo = aux[1:2]                                         # (1, T) OHEM mask
    tm = aux[2:3]                                         # (1, T) training mask

    # Kernel-channel mask: sigmoid(pred_text) > 0.5  <=>  raw logit > 0.
    mk = jnp.where((pred[C - 1:C] > 0.0) & (tm > 0.5), valid, 0.0)   # (1, T)
    mot = mo * valid                                                 # (1, T)

    # Dice partial sums (masks / gt are binary):
    #   a = sum((p*m) * g),  b = sum((p*m) * p),  c = sum(g * m)
    pk = p[:C - 1]
    pm_k = pk * mk                                         # (C-1, T)
    a_k = jnp.sum(pm_k * gk, axis=-1, keepdims=True)       # (C-1, 1)
    b_k = jnp.sum(pm_k * pk, axis=-1, keepdims=True)
    c_k = jnp.sum(gk * mk, axis=-1, keepdims=True)

    pt = p[C - 1:]
    pm_t = pt * mot                                        # (1, T)
    a_t = jnp.sum(pm_t * g_text, axis=-1, keepdims=True)   # (1, 1)
    b_t = jnp.sum(pm_t * pt, axis=-1, keepdims=True)
    c_t = jnp.sum(g_text * mot, axis=-1, keepdims=True)

    upd_k = jnp.concatenate([a_k, b_k, c_k], axis=1)       # (C-1, 3)
    upd_t = jnp.concatenate([a_t, b_t, c_t], axis=1)       # (1, 3)
    acc_ref[...] += jnp.concatenate([upd_k, upd_t], axis=0)  # (C, 3)

    @pl.when(t == pl.num_programs(1) - 1)
    def _():
        out_ref[0] = acc_ref[...]


def dice_sums(pred, gt_kernels_i8, aux_i8, tile=DEFAULT_TILE):
    """pred: (B, C, HW) logits (any float dtype); gt_kernels_i8: (B, C-1, HW)
    int8; aux_i8: (B, 3, HW) int8 [gt_text, ohem_mask, training_mask].
    Returns (B, C, 3) f32 dice sums [a, b, c] per sample & channel."""
    B, C, HW = pred.shape
    assert C >= 2, "PSELoss expects >= 1 kernel channel plus the text channel"

    tile = max(128, min(tile, pl.cdiv(HW, 128) * 128))
    n_tiles = pl.cdiv(HW, tile)
    hw_arr = jnp.array([HW], jnp.int32)

    return pl.pallas_call(
        _dice_sums_kernel,
        out_shape=jax.ShapeDtypeStruct((B, C, 3), jnp.float32),
        grid_spec=pltpu.PrefetchScalarGridSpec(
            num_scalar_prefetch=1,
            grid=(B, n_tiles),
            in_specs=[
                pl.BlockSpec((1, C, tile), lambda b, t, hw: (b, 0, t)),
                pl.BlockSpec((1, C - 1, tile), lambda b, t, hw: (b, 0, t)),
                pl.BlockSpec((1, 3, tile), lambda b, t, hw: (b, 0, t)),
            ],
            out_specs=pl.BlockSpec((1, C, 3), lambda b, t, hw: (b, 0, 0)),
            scratch_shapes=[pltpu.VMEM((C, 3), jnp.float32)],
        ),
        compiler_params=pltpu.CompilerParams(
            dimension_semantics=("parallel", "arbitrary"),
            vmem_limit_bytes=32 * 1024 * 1024),
    )(hw_arr, pred, gt_kernels_i8, aux_i8)


# ------------------------- OHEM (plain JAX glue) -----------------------------
# TODO(synk): the per-sample threshold selection uses a full jnp.sort because
# neg_num has no static bound (it can reach HW); if a static positive-pixel
# bound is known upstream, replace with jax.lax.top_k / a histogram threshold.
def _ohem_single(score, gt_text, training_mask):
    pos = gt_text > 0.5
    tm_pos = training_mask > 0.5
    pos_num = jnp.sum(pos) - jnp.sum(pos & jnp.logical_not(tm_pos))
    neg = jnp.logical_not(pos)
    neg_total = jnp.sum(neg)
    neg_num = jnp.minimum(pos_num * 3, neg_total)

    flat = score.reshape(-1)
    neg_scores = jnp.where(neg.reshape(-1), flat, -jnp.inf)
    sorted_desc = -jnp.sort(-neg_scores)
    idx = jnp.clip(neg_num - 1, 0, flat.shape[0] - 1)
    threshold = sorted_desc[idx]

    # NOTE: ties at the threshold can admit > 3*pos_num negatives; this matches
    # the PyTorch original.
    selected = (((score >= threshold) | pos) & tm_pos).astype(jnp.float32)
    fallback = (pos_num == 0) | (neg_num == 0)
    return jnp.where(fallback, training_mask.astype(jnp.float32), selected)


# ------------------------------- PSELoss --------------------------------------
def pse_loss(pred, gt_texts, gt_kernels, training_masks,
             text_ratio=TEXT_RATIO, eps=EPS, tile=DEFAULT_TILE):
    B, C, H, W = pred.shape
    num_kernels = C - 1
    HW = H * W
    pred_texts = pred[:, -1, :, :]

    ohem_mask = jax.vmap(_ohem_single)(pred_texts, gt_texts, training_masks)

    # pred stays in its native dtype (feed bf16 upstream for the big HBM win);
    # gt / masks travel as int8.  NOTE: int8 casts assume the maps are 0/1
    # valued (true for PSE's text / kernel / training maps).
    pred_f = pred.reshape(B, C, HW)
    gtk_i8 = gt_kernels.reshape(B, num_kernels, HW).astype(jnp.int8)
    aux_i8 = jnp.stack(
        [gt_texts.reshape(B, HW).astype(jnp.int8),
         ohem_mask.reshape(B, HW).astype(jnp.int8),
         training_masks.reshape(B, HW).astype(jnp.int8)], axis=1)   # (B,3,HW)

    sums = dice_sums(pred_f, gtk_i8, aux_i8, tile=tile)     # (B, C, 3)
    a = sums[..., 0]                                        # (B, C)
    b = sums[..., 1] + eps
    c = sums[..., 2] + eps
    per_ch_loss = 1.0 - (2.0 * a) / (b + c)                 # (B, C)

    loss_text = jnp.mean(per_ch_loss[:, C - 1])
    loss_kernels = jnp.mean(per_ch_loss[:, :C - 1])
    loss = text_ratio * loss_text + (1.0 - text_ratio) * loss_kernels
    return {"loss": loss, "loss_text": loss_text, "loss_kernels": loss_kernels}


# ------------------------ pure-JAX reference (check) --------------------------
def _dice_ref(pred, gt, mask, eps=EPS):
    p = jax.nn.sigmoid(pred).reshape(pred.shape[0], -1)
    g = gt.reshape(gt.shape[0], -1)
    m = mask.reshape(mask.shape[0], -1)
    p = p * m
    g = g * m
    a = jnp.sum(p * g, 1)
    b = jnp.sum(p * p, 1) + eps
    c = jnp.sum(g * g, 1) + eps
    return 1.0 - 2.0 * a / (b + c)


def pse_loss_ref(pred, gt_texts, gt_kernels, training_masks):
    pred_texts = pred[:, -1]
    pred_kernels = pred[:, :-1]
    ohem = jax.vmap(_ohem_single)(pred_texts, gt_texts, training_masks)
    loss_text = _dice_ref(pred_texts, gt_texts, ohem).mean()
    sel = ((jax.nn.sigmoid(pred_texts) > 0.5)
           & (training_masks > 0.5)).astype(jnp.float32)
    losses = []
    for i in range(gt_kernels.shape[1]):
        losses.append(_dice_ref(pred_kernels[:, i], gt_kernels[:, i], sel))
    loss_kernels = jnp.stack(losses).mean(0).mean()
    loss = TEXT_RATIO * loss_text + (1.0 - TEXT_RATIO) * loss_kernels
    return {"loss": loss, "loss_text": loss_text, "loss_kernels": loss_kernels}


if __name__ == "__main__":
    key = jax.random.PRNGKey(0)
    k1, k2, k3, k4 = jax.random.split(key, 4)

    B, num_kernels, H, W = 2, 3, 16, 16
    C = num_kernels + 1   # pred channels: kernels + text (last)

    pred = jax.random.normal(k1, (B, C, H, W), jnp.float32)
    gt_texts = (jax.random.uniform(k2, (B, H, W)) > 0.5).astype(jnp.float32)
    gt_kernels = (jax.random.uniform(k3, (B, num_kernels, H, W)) > 0.5
                  ).astype(jnp.float32)
    training_masks = (jax.random.uniform(k4, (B, H, W)) > 0.2
                      ).astype(jnp.float32)

    out = pse_loss(pred, gt_texts, gt_kernels, training_masks)
    jax.block_until_ready(out)
    ref = pse_loss_ref(pred, gt_texts, gt_kernels, training_masks)
    for name in ("loss", "loss_text", "loss_kernels"):
        assert jnp.allclose(out[name], ref[name], rtol=1e-5, atol=1e-5), (
            name, out[name], ref[name])

    # Ragged-HW path: HW = 240 is not a multiple of the 128-lane tile, so the
    # last tile is partial and the in-kernel lane mask must zero it out.
    H2, W2 = 16, 15
    pred2 = jax.random.normal(k1, (B, C, H2, W2), jnp.float32)
    gt_texts2 = (jax.random.uniform(k2, (B, H2, W2)) > 0.5).astype(jnp.float32)
    gt_kernels2 = (jax.random.uniform(k3, (B, num_kernels, H2, W2)) > 0.5
                   ).astype(jnp.float32)
    training_masks2 = (jax.random.uniform(k4, (B, H2, W2)) > 0.2
                       ).astype(jnp.float32)

    out2 = pse_loss(pred2, gt_texts2, gt_kernels2, training_masks2, tile=128)
    jax.block_until_ready(out2)
    ref2 = pse_loss_ref(pred2, gt_texts2, gt_kernels2, training_masks2)
    for name in ("loss", "loss_text", "loss_kernels"):
        assert jnp.allclose(out2[name], ref2[name], rtol=1e-5, atol=1e-5), (
            name, out2[name], ref2[name])

    print("KERNEL_OK")
</pallas_src>

<mosaic_0001>
module attributes {stable_mosaic.version = 11 : i64} {
  func.func @_dice_sums_kernel(%arg0: i32, %arg1: i32, %arg2: memref<1xi32, #tpu.memory_space<smem>>, %arg3: memref<1x4x256xf32, #tpu.memory_space<vmem>>, %arg4: memref<1x3x256xi8, #tpu.memory_space<vmem>>, %arg5: memref<1x3x256xi8, #tpu.memory_space<vmem>>, %arg6: memref<1x4x3xf32, #tpu.memory_space<vmem>>, %arg7: memref<4x3xf32, #tpu.memory_space<vmem>>) attributes {dimension_semantics = [#tpu.dimension_semantics<parallel>, #tpu.dimension_semantics<arbitrary>], iteration_bounds = array<i64: 2, 1>, scalar_prefetch = 1 : i64, scratch_operands = 1 : i64, tpu.core_type = #tpu.core_type<tc>, window_params = [{transform_indices = @transform_0, window_bounds = array<i64: 1, 4, 256>}, {transform_indices = @transform_1, window_bounds = array<i64: 1, 3, 256>}, {transform_indices = @transform_2, window_bounds = array<i64: 1, 3, 256>}, {transform_indices = @transform_3, window_bounds = array<i64: 1, 4, 3>}]} {
    %c0_i32 = arith.constant 0 : i32
    %0 = arith.cmpi eq, %arg1, %c0_i32 : i32
    %1 = arith.extui %0 : i1 to i32
    %c0_i32_0 = arith.constant 0 : i32
    %2 = arith.cmpi ne, %1, %c0_i32_0 : i32
    scf.if %2 {
      %cst_28 = arith.constant 0.000000e+00 : f32
      %76 = vector.broadcast %cst_28 : f32 to vector<4x3xf32>
      %c0_29 = arith.constant 0 : index
      %c0_30 = arith.constant 0 : index
      %77 = vector.load %arg7[%c0_29, %c0_30] : memref<4x3xf32, #tpu.memory_space<vmem>>, vector<4x3xf32>
      tpu.vector_store %arg7[%c0_29, %c0_30], %76 {strides = array<i32>} : memref<4x3xf32, #tpu.memory_space<vmem>>, vector<4x3xf32>,
    } else {
    }
    %c0 = arith.constant 0 : index
    %c0_1 = arith.constant 0 : index
    %c0_2 = arith.constant 0 : index
    %3 = vector.load %arg3[%c0, %c0_1, %c0_2] : memref<1x4x256xf32, #tpu.memory_space<vmem>>, vector<1x4x256xf32>
    %4 = vector.shape_cast %3 : vector<1x4x256xf32> to vector<4x256xf32>
    %5 = tpu.iota {dimensions = array<i32: 1>} : vector<1x256xi32>
    %c256_i32 = arith.constant 256 : i32
    %6 = arith.muli %arg1, %c256_i32 : i32
    %7 = vector.broadcast %6 : i32 to vector<1x256xi32>
    %8 = arith.addi %5, %7 : vector<1x256xi32>
    %c0_3 = arith.constant 0 : index
    %9 = memref.load %arg2[%c0_3] : memref<1xi32, #tpu.memory_space<smem>>
    %10 = vector.broadcast %9 : i32 to vector<1x256xi32>
    %11 = arith.cmpi slt, %8, %10 : vector<1x256xi32>
    %12 = arith.extui %11 : vector<1x256xi1> to vector<1x256xi32>
    %13 = arith.sitofp %12 : vector<1x256xi32> to vector<1x256xf32>
    %cst = arith.constant 0.000000e+00 : f32
    %14 = vector.shape_cast %11 : vector<1x256xi1> to vector<1x256xi1>
    %15 = vector.broadcast %14 : vector<1x256xi1> to vector<4x256xi1>
    %16 = vector.broadcast %cst : f32 to vector<4x256xf32>
    %17 = arith.select %15, %4, %16 : vector<4x256xi1>, vector<4x256xf32>
    %cst_4 = arith.constant 5.000000e-01 : f32
    %18 = vector.broadcast %cst_4 : f32 to vector<4x256xf32>
    %19 = arith.mulf %18, %17 : vector<4x256xf32>
    %20 = math.tanh %19 : vector<4x256xf32>
    %cst_5 = arith.constant 1.000000e+00 : f32
    %21 = vector.broadcast %cst_5 : f32 to vector<4x256xf32>
    %22 = arith.addf %20, %21 : vector<4x256xf32>
    %cst_6 = arith.constant 5.000000e-01 : f32
    %23 = vector.broadcast %cst_6 : f32 to vector<4x256xf32>
    %24 = arith.mulf %23, %22 : vector<4x256xf32>
    %c0_7 = arith.constant 0 : index
    %c0_8 = arith.constant 0 : index
    %c0_9 = arith.constant 0 : index
    %25 = vector.load %arg4[%c0_7, %c0_8, %c0_9] : memref<1x3x256xi8, #tpu.memory_space<vmem>>, vector<1x3x256xi8>
    %26 = vector.shape_cast %25 : vector<1x3x256xi8> to vector<3x256xi8>
    %27 = arith.sitofp %26 : vector<3x256xi8> to vector<3x256xf32>
    %c0_10 = arith.constant 0 : index
    %c0_11 = arith.constant 0 : index
    %c0_12 = arith.constant 0 : index
    %28 = vector.load %arg5[%c0_10, %c0_11, %c0_12] : memref<1x3x256xi8, #tpu.memory_space<vmem>>, vector<1x3x256xi8>
    %29 = vector.shape_cast %28 : vector<1x3x256xi8> to vector<3x256xi8>
    %30 = arith.sitofp %29 : vector<3x256xi8> to vector<3x256xf32>
    %31 = vector.extract_strided_slice %30 {offsets = [0, 0], sizes = [1, 256], strides = [1, 1]} : vector<3x256xf32> to vector<1x256xf32>
    %32 = vector.extract_strided_slice %30 {offsets = [1, 0], sizes = [1, 256], strides = [1, 1]} : vector<3x256xf32> to vector<1x256xf32>
    %33 = vector.extract_strided_slice %30 {offsets = [2, 0], sizes = [1, 256], strides = [1, 1]} : vector<3x256xf32> to vector<1x256xf32>
    %34 = vector.extract_strided_slice %17 {offsets = [3, 0], sizes = [1, 256], strides = [1, 1]} : vector<4x256xf32> to vector<1x256xf32>
    %cst_13 = arith.constant 0.000000e+00 : f32
    %35 = vector.broadcast %cst_13 : f32 to vector<1x256xf32>
    %36 = arith.cmpf ogt, %34, %35 : vector<1x256xf32>
    %cst_14 = arith.constant 5.000000e-01 : f32
    %37 = vector.broadcast %cst_14 : f32 to vector<1x256xf32>
    %38 = arith.cmpf ogt, %33, %37 : vector<1x256xf32>
    %39 = arith.andi %36, %38 : vector<1x256xi1>
    %cst_15 = arith.constant 0.000000e+00 : f32
    %40 = vector.broadcast %cst_15 : f32 to vector<1x256xf32>
    %41 = arith.select %39, %13, %40 : vector<1x256xi1>, vector<1x256xf32>
    %42 = arith.mulf %32, %13 : vector<1x256xf32>
    %43 = vector.extract_strided_slice %24 {offsets = [0, 0], sizes = [3, 256], strides = [1, 1]} : vector<4x256xf32> to vector<3x256xf32>
    %44 = vector.broadcast %41 : vector<1x256xf32> to vector<3x256xf32>
    %45 = arith.mulf %43, %44 : vector<3x256xf32>
    %46 = arith.mulf %45, %27 : vector<3x256xf32>
    %cst_16 = arith.constant dense<0.000000e+00> : vector<3xf32>
    %47 = vector.multi_reduction <add>, %46, %cst_16 [1] : vector<3x256xf32> to vector<3xf32>
    %48 = vector.shape_cast %47 : vector<3xf32> to vector<3x1xf32>
    %49 = arith.mulf %45, %43 : vector<3x256xf32>
    %cst_17 = arith.constant dense<0.000000e+00> : vector<3xf32>
    %50 = vector.multi_reduction <add>, %49, %cst_17 [1] : vector<3x256xf32> to vector<3xf32>
    %51 = vector.shape_cast %50 : vector<3xf32> to vector<3x1xf32>
    %52 = vector.broadcast %41 : vector<1x256xf32> to vector<3x256xf32>
    %53 = arith.mulf %27, %52 : vector<3x256xf32>
    %cst_18 = arith.constant dense<0.000000e+00> : vector<3xf32>
    %54 = vector.multi_reduction <add>, %53, %cst_18 [1] : vector<3x256xf32> to vector<3xf32>
    %55 = vector.shape_cast %54 : vector<3xf32> to vector<3x1xf32>
    %56 = vector.extract_strided_slice %24 {offsets = [3, 0], sizes = [1, 256], strides = [1, 1]} : vector<4x256xf32> to vector<1x256xf32>
    %57 = arith.mulf %56, %42 : vector<1x256xf32>
    %58 = arith.mulf %57, %31 : vector<1x256xf32>
    %cst_19 = arith.constant dense<0.000000e+00> : vector<1xf32>
    %59 = vector.multi_reduction <add>, %58, %cst_19 [1] : vector<1x256xf32> to vector<1xf32>
    %60 = vector.shape_cast %59 : vector<1xf32> to vector<1x1xf32>
    %61 = arith.mulf %57, %56 : vector<1x256xf32>
    %cst_20 = arith.constant dense<0.000000e+00> : vector<1xf32>
    %62 = vector.multi_reduction <add>, %61, %cst_20 [1] : vector<1x256xf32> to vector<1xf32>
    %63 = vector.shape_cast %62 : vector<1xf32> to vector<1x1xf32>
    %64 = arith.mulf %31, %42 : vector<1x256xf32>
    %cst_21 = arith.constant dense<0.000000e+00> : vector<1xf32>
    %65 = vector.multi_reduction <add>, %64, %cst_21 [1] : vector<1x256xf32> to vector<1xf32>
    %66 = vector.shape_cast %65 : vector<1xf32> to vector<1x1xf32>
    %67 = tpu.concatenate %48, %51, %55 in 1 : vector<3x1xf32>, vector<3x1xf32>, vector<3x1xf32> -> vector<3x3xf32>
    %68 = tpu.concatenate %60, %63, %66 in 1 : vector<1x1xf32>, vector<1x1xf32>, vector<1x1xf32> -> vector<1x3xf32>
    %c0_22 = arith.constant 0 : index
    %c0_23 = arith.constant 0 : index
    %69 = vector.load %arg7[%c0_22, %c0_23] : memref<4x3xf32, #tpu.memory_space<vmem>>, vector<4x3xf32>
    %70 = tpu.concatenate %67, %68 in 0 : vector<3x3xf32>, vector<1x3xf32> -> vector<4x3xf32>
    %71 = arith.addf %69, %70 : vector<4x3xf32>
    %c0_24 = arith.constant 0 : index
    %c0_25 = arith.constant 0 : index
    %72 = vector.load %arg7[%c0_24, %c0_25] : memref<4x3xf32, #tpu.memory_space<vmem>>, vector<4x3xf32>
    tpu.vector_store %arg7[%c0_24, %c0_25], %71 {strides = array<i32>} : memref<4x3xf32, #tpu.memory_space<vmem>>, vector<4x3xf32>,
    %c0_i32_26 = arith.constant 0 : i32
    %73 = arith.cmpi eq, %arg1, %c0_i32_26 : i32
    %74 = arith.extui %73 : i1 to i32
    %c0_i32_27 = arith.constant 0 : i32
    %75 = arith.cmpi ne, %74, %c0_i32_27 : i32
    scf.if %75 {
      %c0_28 = arith.constant 0 : index
      %c0_29 = arith.constant 0 : index
      %76 = vector.load %arg7[%c0_28, %c0_29] : memref<4x3xf32, #tpu.memory_space<vmem>>, vector<4x3xf32>
      %c0_30 = arith.constant 0 : index
      %c0_31 = arith.constant 0 : index
      %c0_32 = arith.constant 0 : index
      %77 = vector.load %arg6[%c0_30, %c0_31, %c0_32] : memref<1x4x3xf32, #tpu.memory_space<vmem>>, vector<1x4x3xf32>
      %78 = vector.shape_cast %77 : vector<1x4x3xf32> to vector<4x3xf32>
      %79 = vector.shape_cast %76 : vector<4x3xf32> to vector<1x4x3xf32>
      tpu.vector_store %arg6[%c0_30, %c0_31, %c0_32], %79 {strides = array<i32>} : memref<1x4x3xf32, #tpu.memory_space<vmem>>, vector<1x4x3xf32>,
    } else {
    }
    return
  }
  func.func @transform_0(%arg0: i32, %arg1: i32, %arg2: memref<1xi32, #tpu.memory_space<smem>>) -> (i32, i32, i32) {
    %c0_i32 = arith.constant 0 : i32
    %c0_i32_0 = arith.constant 0 : i32
    return %arg0, %c0_i32, %arg1 : i32, i32, i32
  }
  func.func @transform_1(%arg0: i32, %arg1: i32, %arg2: memref<1xi32, #tpu.memory_space<smem>>) -> (i32, i32, i32) {
    %c0_i32 = arith.constant 0 : i32
    %c0_i32_0 = arith.constant 0 : i32
    return %arg0, %c0_i32, %arg1 : i32, i32, i32
  }
  func.func @transform_2(%arg0: i32, %arg1: i32, %arg2: memref<1xi32, #tpu.memory_space<smem>>) -> (i32, i32, i32) {
    %c0_i32 = arith.constant 0 : i32
    %c0_i32_0 = arith.constant 0 : i32
    return %arg0, %c0_i32, %arg1 : i32, i32, i32
  }
  func.func @transform_3(%arg0: i32, %arg1: i32, %arg2: memref<1xi32, #tpu.memory_space<smem>>) -> (i32, i32, i32) {
    %c0_i32 = arith.constant 0 : i32
    %c0_i32_0 = arith.constant 0 : i32
    %c0_i32_1 = arith.constant 0 : i32
    return %arg0, %c0_i32, %c0_i32_0 : i32, i32, i32
  }
}

</mosaic_0001>

<bundles_post_ra>
// kernel: tpu_custom_call.1
= control target key start
LH: loop header
LB: loop body
LE: loop exit
PB: predicated region body
PF: predicated region fallthrough
CT: control target
= control target key end

     0   :  { %s919_s0 = inlined_call_operand.<no memory space> [shape: s32[1], index: 0, kind: input, shape index: {}]   ;;  %s920_s1 = inlined_call_operand.hbm [shape: f32[2,4,256], index: 1, kind: input, shape index: {}]   ;;  %s921_s2 = inlined_call_operand.vmem [shape: s8[2,3,256], index: 2, kind: input, shape index: {}]   ;;  %s922_s3 = inlined_call_operand.vmem [shape: s8[2,3,256], index: 3, kind: input, shape index: {}]   ;;  %s923_s4 = inlined_call_operand.vmem [shape: f32[2,4,3], index: 4, kind: output, shape index: {}]  }
   0x1   :  { %9 = sst [smem:[#allocation4]] %s919_s0 }
   0x2   :  { %10 = vsyncpa [#allocation6], 0 }
   0x3   :  { %12 = vsyncpa [#allocation6 + $0x1], 0  ;;  %s758_s17 = smov 0   ;;  %s760_s18 = smov 0  }
   0x4   :  { %s762_s19 = smov 0   ;;  %s764_s20 = smov 0  }
   0x5   :  { %s766_s21 = smov 0   ;;  %s768_s22 = smov 0  }
   0x6 LB: > { %s565_s0 = sadd.s32 4294967295, %s725_s22   ;;  %s30_s23 = sadd.s32 1, %s721_s21  ;;  %s725_s22 = sphi %s768_s22, %s18_s22   ;;  %s721_s21 = sphi %s766_s21, %s933_s21   ;;  %s717_s20 = sphi %s764_s20, %s932_s20   ;;  %s713_s19 = sphi %s762_s19, %s931_s19   ;;  %s709_s18 = sphi %s760_s18, %s930_s18   ;;  %s705_s17 = sphi %s758_s17, %s929_s17  }
   0x7   : > { %p32_p0 = scmp.ge.s32.totalorder %s30_s23, 2  ;;  %s39_s24 = sadd.s32 1, %s713_s19 }
   0x8   : > { %p46_p1 = scmp.ne.s32.totalorder %s713_s19, %s709_s18  ;;  %p47_p2 = scmp.eq.s32.totalorder %s725_s22, 0 }
   0x9   : > { %s935_s23 = smov (%p32_p0, %s30_s23), 0  ;;  %p52_p4 = scmp.ne.s32.totalorder %s709_s18, %s705_s17 }
   0xa   : > { %p794_p3 = por %p47_p2, %p46_p1  ;;  %s34_s26 = ssub.s32 %s721_s21, %s935_s23 }
   0xb   : > { %p53_p5 = scmp.eq.s32.totalorder %s565_s0, 0  ;;  %p37_p6 = scmp.eq.s32.totalorder %s34_s26, 0 }
   0xc   : > { %p589_p8 = scmp.lt.s32.totalorder %s725_s22, 2  ;;  %s158_s29 = sand.u32 1, %s713_s19  }
   0xd   : > { %p801_p7 = por %p53_p5, %p52_p4  ;;  %s582_s30 = sshll.u32 %s721_s21, 7 }
   0xe   : > { %s807_s28 = scalar_select %p37_p6, %s713_s19, %s39_s24  }
   0xf   : > { %s569_s5 = sshll.u32 %s158_s29, 3  ;;  %s814_s8 = scalar_lea.hbm %s920_s1, %s582_s30 }
  0x10   : > { %s162_s9 = scalar_lea.vmem [#allocation5], %s569_s5  ;;  %p818_p9 = pnand %p589_p8, %p794_p3 }
  0x11   : > { %s172_s10 = sshll.u32 %s162_s9, 4  ;;  %s159_s12 = scalar_lea.sflag [#allocation6], %s158_s29  ;;  %s822_s10 = int_to_ptr.vmem [resolvable:$true] %s172_s10 }
  0x12   : > { %s645_s13 = scalar_lea.hbm %s814_s8, 128  ;;  %p647_p13 = pneg %p818_p9 }
  0x13   : > { %p646_p12 = scmp.ne.s32.totalorder %s814_s8, %s645_s13  ;;  %s650_s16 = scalar_lea.hbm %s920_s1, 256 }
  0x14   : > { %p651_p2 = scmp.lt.u32.totalorder %s814_s8, %s920_s1  ;;  %p652_p3 = scmp.lt.u32.totalorder %s650_s16, %s645_s13 }
  0x15   : > { %p648_p0 = pnand %p647_p13, %p646_p12  ;;  %p654_p5 = scmp.lt.u32.totalorder %s645_s13, %s814_s8 }
  0x16   : > { %p653_p4 = por %p652_p3, %p651_p2 }
  0x17   : > { %p649_p1 = pneg %p648_p0 }
  0x18   : > { %p655_p6 = por %p654_p5, %p653_p4 }
  0x1a   : > { %p656_p8 = pnand %p655_p6, %p649_p1 }
  0x1c   : > { %659 = shalt.err (!%p656_p8)
}
  0x1d   : > { %s660_s24 = scalar_lea.vmem %s822_s10, 128  ;;  %s727_s25 = smov [#allocation5]  }
  0x1e   : > { %p661_p12 = scmp.ne.s32.totalorder %s822_s10, %s660_s24  ;;  %s665_s26 = sshll.u32 %s727_s25, 4  ;;  %s666_s26 = int_to_ptr.vmem [resolvable:$false] %s665_s26 }
  0x1f   : > { %s667_s29 = scalar_lea.vmem %s666_s26, 256  ;;  %p668_p11 = scmp.lt.s32.totalorder %s822_s10, %s666_s26 }
  0x20   : > { %p663_p0 = pnand %p661_p12, %p647_p13  ;;  %p669_p2 = scmp.lt.s32.totalorder %s667_s29, %s660_s24 }
  0x22   : > { %p664_p10 = pneg %p663_p0  ;;  %p670_p3 = por %p669_p2, %p668_p11 }
  0x24   : > { %p671_p4 = pnand %p670_p3, %p664_p10 }
  0x26   : > { %674 = shalt.err (!%p671_p4)
}
  0x27   : > { %588 = dma.hbm_to_vmem [thread:$0]  (!%p818_p9), %s814_s8, 128, %s822_s10, %s159_s12  }
  0x28   : > { %p927_p1 = scmp.lt.s32.totalorder %s725_s22, 3  ;;  %p928_p5 = scmp.ge.s32.totalorder %s725_s22, 1 }
  0x2a   : > { %p202_p13 = pnand %p928_p5, %p927_p1 }
  0x2b   : > { %s207_s30 = sand.u32 (!%p202_p13), 1, %s709_s18  }
  0x2c   : > { %205 = sbr.rel (%p202_p13) target bundleno = 249 (0xf9), region = 32  ;;  %s573_s5 = sshll.u32 (!%p202_p13), %s207_s30, 3 }
  0x2d   : > { %s208_s6 = scalar_lea.sflag (!%p202_p13), [#allocation6], %s207_s30  ;;  %s211_s7 = scalar_lea.vmem (!%p202_p13), [#allocation5], %s573_s5 }
  0x33   : > { %700 = dma.done.wait (%p801_p7), %s208_s6, 128  }
  0x34   : > { %702 = vsyncadd (%p801_p7), %s208_s6, 4294967168  ;;  %p251_p10 = scmp.lt.s32.totalorder %s717_s20, 1  ;;  %v279_v0 = vlaneseq  ;;  %s286_s8 = sld [smem:[#allocation4]]  ;;  %v278_v6 = vld [vmem:[%s211_s7] sm:$0xff]  ;;  %v728_v10 = vmov 0.0   ;;  %v729_v21 = vmov 0  }
  0x35   : > { %v297_v9 = vcombine.high %v278_v6, %v278_v6  ;;  %vm434_vm9 = vcmask 1040384   ;;  %vm354_vm10 = vcmask 1042432   ;;  %vm406_vm11 = vcmask 1043459  }
  0x36   : > { %s937_s20 = smov (!%p251_p10, %s717_s20), 1  ;;  %v280_v1 = vand.u32 127, %v279_v0  ;;  %v864_v2 = vshrl.u32 %v279_v0, 7  ;;  %vm276_vm12 = vcmask 19456   ;;  %vm440_vm13 = vcmask 7168  }
  0x37   : > { %s574_s9 = sshll.u32 %s937_s20, 1  ;;  %277 = vst.msk [vmem:[#allocation2] sm:$0xf] %vm276_vm12, %v728_v10  ;;  %vm442_vm14 = vcmask 15360   ;;  %s576_s15 = sshll.u32 %s937_s20, 2 }
  0x38   : > { %v281_v3 = vadd.s32 128, %v280_v1  ;;  %s266_s12 = scalar_lea.vmem %s922_s3, %s574_s9  ;;  %v321_v7 = vsub.s32 2, %v864_v2  ;;  %v325_v14 = vsub.s32 6, %v864_v2  ;;  %s257_s14 = scalar_lea.vmem %s921_s2, %s574_s9  ;;  %v396_v26 = vsub.s32 0, %v864_v2 }
  0x39   : > { %v312_v5 = vld [vmem:[%s266_s12] sm:$0x3]  ;;  %v400_v27 = vsub.s32 4, %v864_v2  ;;  %v341_v30 = vsub.s32 3, %v864_v2  ;;  %v383_v35 = vsub.s32 1, %v864_v2  ;;  %v387_v36 = vsub.s32 5, %v864_v2  ;;  %s271_s0 = scalar_lea.vmem %s923_s4, %s576_s15 }
  0x3a   : > { %v287_v4 = vstv %s286_s8  ;;  %v313_v8 = vunpack.c.0.s8 %v312_v5  ;;  %v309_v28 = vld [vmem:[%s257_s14] sm:$0x3] }
  0x3b   : > { %vm288_vm0 = vcmp.lt.s32.totalorder %v280_v1, %v287_v4  ;;  %vm289_vm1 = vcmp.lt.s32.totalorder %v281_v3, %v287_v4  ;;  %v310_v33 = vunpack.c.0.s8 %v309_v28 }
  0x3c   : > { %v577_v11 = vsel %vm288_vm0, 1.0, %v728_v10  ;;  %v578_v12 = vsel %vm289_vm1, 1.0, %v728_v10  ;;  %v299_v13 = vsel %vm288_vm0, %v278_v6, 0.0  ;;  %v314_v15 = vcvt.s32.f32 %v313_v8 }
  0x3d   : > { %v335_v16 = vcombine.low %v577_v11, %v578_v12  ;;  %v300_v17 = vsel %vm289_vm1, %v297_v9, 0.0  ;;  %v301_v18 = vmul.f32 0.5, %v299_v13  ;;  %vm315_vm3 = vcmp.gt.f32.partialorder %v299_v13, 0.0 }
  0x3e   : > { %v302_v19 = vmul.f32 0.5, %v300_v17  ;;  %vm317_vm2 = vcmp.gt.f32.partialorder %v314_v15, 0.5  ;;  %vm316_vm4 = vcmp.gt.f32.partialorder %v300_v17, 0.0  ;;  %v311_v44 = vcvt.s32.f32 %v310_v33 }
  0x3f   : > { %v336_v20 = vrot.slane %v335_v16, 7  ;;  %641 = vtanh.f32 %v301_v18  ;;  %v318_v22 = vsel %vm317_vm2, 1, %v729_v21  ;;  %v397_v54 = vrot.slane %v314_v15, %v396_v26 }
  0x40   : > { %643 = vtanh.f32 %v302_v19  ;;  %v322_v24 = vrot.slane %v318_v22, %v321_v7  ;;  %v326_v25 = vrot.slane %v318_v22, %v325_v14  ;;  %v350_v56 = vcombine.high %v311_v44, %v311_v44 }
  0x41   : > { %v338_v23 = vmul.f32 %v336_v20, %v314_v15  ;;  %v401_v57 = vrot.slane %v314_v15, %v400_v27 }
  0x42   : > { %vm327_vm5 = vcmp.ne.s32.totalorder %v322_v24, 0  ;;  %vm328_vm6 = vcmp.ne.s32.totalorder %v326_v25, 0 }
  0x43   : > { %v579_v29 = vrot.slane %v338_v23, 9  ;;  %vm329_vm7 = vmand %vm315_vm3, %vm327_vm5  ;;  %v384_v49 = vrot.slane %v338_v23, %v383_v35  ;;  %v388_v51 = vrot.slane %v338_v23, %v387_v36 }
  0x44   : > { %vm330_vm8 = vmand %vm316_vm4, %vm328_vm6  ;;  %v331_v32 = vsel %vm329_vm7, %v577_v11, 0.0 }
  0x45   : > { %v422_v31 = vmul.f32 %v579_v29, %v314_v15  ;;  %v332_v34 = vsel %vm330_vm8, %v578_v12, 0.0  ;;  %v342_v39 = vrot.slane %v331_v32, %v341_v30  ;;  %v449_v32 = vld [vmem:[#allocation2] sm:$0xf] }
  0x46   : > { %v346_v40 = vrot.slane %v332_v34, %v341_v30 }
  0x47   : > { %v427_v37 = vrot.slane %v422_v31, %v396_v26  ;;  %v431_v38 = vrot.slane %v422_v31, %v400_v27 }
  0x48   : > { %v369_v45 = vcombine.low %v342_v39, %v346_v40 }
  0x49   : > { %v642_v41 = vpop.eup %641  ;;  %v435_v42 = vsel %vm434_vm9, %v427_v37, 0.0  ;;  %v436_v43 = vsel %vm434_vm9, %v431_v38, 0.0 }
  0x4a   : > { %v644_v46 = vpop.eup %643  ;;  %v437_v47 = vadd.f32 %v436_v43, %v435_v42  ;;  %v305_v48 = vadd.f32 1.0, %v642_v41  ;;  %v371_v52 = vmul.f32 %v369_v45, %v311_v44 }
  0x4b   : > { %v306_v50 = vadd.f32 1.0, %v644_v46 }
  0x4c   : > { %438 = vadd.xlane.f32.xlu0 %v437_v47  ;;  %v307_v53 = vmul.f32 0.5, %v305_v48  ;;  %v373_v62 = vcombine.high %v371_v52, %v371_v52  ;;  %v375_v20 = vsel %vm354_vm10, %v371_v52, 0.0 }
  0x4d   : > { %v308_v55 = vmul.f32 0.5, %v306_v50 }
  0x4e   : > { %v347_v58 = vmul.f32 %v342_v39, %v307_v53  ;;  %v391_v59 = vmul.f32 %v384_v49, %v307_v53  ;;  %v376_v21 = vsel %vm354_vm10, %v373_v62, 0.0 }
  0x4f   : > { %v348_v60 = vmul.f32 %v346_v40, %v308_v55  ;;  %v392_v61 = vmul.f32 %v388_v51, %v308_v55  ;;  %v377_v22 = vadd.f32 %v376_v21, %v375_v20 }
  0x50   : > { %v360_v63 = vmul.f32 %v347_v58, %v307_v53  ;;  %v352_v0 = vmul.f32 %v347_v58, %v311_v44  ;;  %v404_v1 = vmul.f32 %v397_v54, %v391_v59  ;;  %v412_v2 = vmul.f32 %v391_v59, %v307_v53 }
  0x51   : > { %v361_v3 = vmul.f32 %v348_v60, %v308_v55  ;;  %v353_v4 = vmul.f32 %v350_v56, %v348_v60  ;;  %v405_v5 = vmul.f32 %v401_v57, %v392_v61  ;;  %v413_v6 = vmul.f32 %v392_v61, %v308_v55 }
  0x52   : > { %v362_v7 = vsel %vm354_vm10, %v360_v63, 0.0  ;;  %v355_v8 = vsel %vm354_vm10, %v352_v0, 0.0  ;;  %v407_v9 = vsel %vm406_vm11, %v404_v1, 0.0  ;;  %v414_v11 = vsel %vm406_vm11, %v412_v2, 0.0 }
  0x53   : > { %v363_v12 = vsel %vm354_vm10, %v361_v3, 0.0  ;;  %v356_v13 = vsel %vm354_vm10, %v353_v4, 0.0  ;;  %v408_v14 = vsel %vm406_vm11, %v405_v5, 0.0  ;;  %v415_v15 = vsel %vm406_vm11, %v413_v6, 0.0 }
  0x54   : > { %v364_v16 = vadd.f32 %v363_v12, %v362_v7  ;;  %v357_v17 = vadd.f32 %v356_v13, %v355_v8  ;;  %v409_v18 = vadd.f32 %v408_v14, %v407_v9  ;;  %v416_v19 = vadd.f32 %v415_v15, %v414_v11 }
  0x56   : > { %365 = vadd.xlane.f32.xlu1 %v364_v16  ;;  %358 = vadd.xlane.f32.xlu0 %v357_v17 }
  0x5a   : > { %410 = vadd.xlane.f32.xlu1 %v409_v18  ;;  %417 = vadd.xlane.f32.xlu0 %v416_v19 }
  0x5e   : > { %378 = vadd.xlane.f32.xlu1 %v377_v22 }
  0xd9   : > { %v439_v23 = vpop.xlane.xlu0 %438 }
  0xda   : > { %v445_v29 = vrot.slane %v439_v23, 5 }
  0xe3   : > { %v366_v24 = vpop.xlane.xlu1 %365  ;;  %v359_v25 = vpop.xlane.xlu0 %358 }
  0xe4   : > { %v441_v30 = vsel %vm440_vm13, %v359_v25, %v366_v24 }
  0xe7   : > { %v411_v26 = vpop.xlane.xlu1 %410  ;;  %v418_v27 = vpop.xlane.xlu0 %417 }
  0xe8   : > { %v447_v28 = vsel %vm440_vm13, %v411_v26, %v418_v27 }
  0xe9   : > { %v448_v33 = vsel %vm442_vm14, %v447_v28, %v445_v29 }
  0xeb   : > { %v379_v31 = vpop.xlane.xlu1 %378 }
  0xec   : > { %v443_v34 = vsel %vm442_vm14, %v441_v30, %v379_v31 }
  0xed   : > { %v450_v35 = vsel %vm354_vm10, %v443_v34, %v448_v33 }
  0xee   : > { %v451_v36 = vadd.f32 %v450_v35, %v449_v32 }
  0xf0   : > { %453 = vst.msk [vmem:[#allocation2] sm:$0xf] %vm276_vm12, %v451_v36 }
  0xf7   : > { %v457_v10 = vld [vmem:[#allocation2] sm:$0xf] }
  0xf8   : > { %458 = vst.msk [vmem:[%s271_s0] sm:$0xf] %vm276_vm12, %v457_v10 }
  0xf9 PF: > { %s18_s22 = sadd.s32 1, %s725_s22   ;;  %s929_s17 = smov %s709_s18 }
  0xfa   : > { %p15_p7 = scmp.ge.s32.totalorder %s18_s22, 4   ;;  %s930_s18 = smov %s713_s19 }
  0xfb   : > { %s931_s19 = smov %s807_s28  ;;  %s932_s20 = smov %s721_s21 }
  0xfc   : > { %s933_s21 = smov %s935_s23  ;;  %17 = sbr.rel (!%p15_p7) target bundleno = 6 (0x6), region = 86 }
 0x103   :  { %478 = vsyncpa [#allocation6], 1 }
 0x104   :  { %480 = vsyncpa [#allocation6 + $0x1], 1 }

</bundles_post_ra>
